<compile_context>
chip_gen: v7x
topology: tpu7x:2x2x1
jax: 0.10.0
libtpu: 0.0.40
codegen_flags: <defaults>
</compile_context>

<pallas_src>
import math

import numpy as np
import jax
import jax.numpy as jnp
from jax import lax
from jax.experimental import pallas as pl
from jax.experimental.pallas import tpu as pltpu

# ---- small config consistent with the LlamaConfig fields the module uses ----
VOCAB_SIZE = 128
HIDDEN_SIZE = 32
INTERMEDIATE_SIZE = 64
NUM_HEADS = 4
HEAD_DIM = HIDDEN_SIZE // NUM_HEADS
NUM_LAYERS = 2
SEQ_LEN = 8
RMS_EPS = 1e-6
ROPE_BASE = 10000.0

# Optional knob (v6e/v7x): feed bf16 operands to the MXU (f32 accumulation is
# kept via preferred_element_type). Left False so numerics match the f32
# PyTorch reference; the MXU is nowhere near the bottleneck at this size, and
# v5e vector math must stay f32 anyway.
MXU_BF16 = False


def _mm(a, b):
    if MXU_BF16:
        a = a.astype(jnp.bfloat16)
        b = b.astype(jnp.bfloat16)
    return jnp.dot(a, b, preferred_element_type=jnp.float32)


def _rmsnorm(x, w):
    var = jnp.mean(x * x, axis=-1, keepdims=True)
    return x * lax.rsqrt(var + RMS_EPS) * w


# --------------------------- fused model kernel ----------------------------
def fused_model_kernel(x_ref, mask_ref, cos_ref, sin_ref, rotp_ref,
                       rn1_ref, wqkv_ref, wo_ref, rn2_ref, wgu_ref, wd_ref,
                       rmsw_ref, final_ref, stack_ref, h_ref):
    li = pl.program_id(0)

    @pl.when(li == 0)
    def _():
        h_ref[...] = x_ref[...]          # seed the resident hidden state
        stack_ref[0] = x_ref[...]        # layers_output[0] = embeddings

    x = h_ref[...]                       # (S, H) f32
    cos = cos_ref[...]                   # (S, H)  per-head-tiled cos
    sin = sin_ref[...]
    mask_add = mask_ref[...]             # (S, S)  0 / -1e30 additive mask
    rot_p = rotp_ref[...]                # (H, H)  per-head rotate_half matrix

    # ----- attention sub-block: x + o_proj(attn(rope(q), rope(k), v)) -----
    gx = _rmsnorm(x, rn1_ref[0])
    qkv = _mm(gx, wqkv_ref[0])                                 # (S, 3H)
    q = qkv[:, :HIDDEN_SIZE]                                   # scale folded in Wq
    k = qkv[:, HIDDEN_SIZE:2 * HIDDEN_SIZE]
    v = qkv[:, 2 * HIDDEN_SIZE:]

    # RoPE on all heads at once: rotate_half(t) == t @ rot_p
    q = q * cos + _mm(q, rot_p) * sin
    k = k * cos + _mm(k, rot_p) * sin

    heads = []
    for h in range(NUM_HEADS):           # static, fully unrolled head loop
        sl = slice(h * HEAD_DIM, (h + 1) * HEAD_DIM)
        qh = q[:, sl]
        kh = k[:, sl]
        vh = v[:, sl]
        # contract the last dims directly (no explicit transpose)
        scores = lax.dot_general(qh, kh, (((1,), (1,)), ((), ())),
                                 preferred_element_type=jnp.float32)
        scores = scores + mask_add
        scores = scores - jnp.max(scores, axis=-1, keepdims=True)
        p = jnp.exp(scores)
        p = p * pl.reciprocal(jnp.sum(p, axis=-1, keepdims=True), approx=True)
        heads.append(jnp.dot(p, vh, preferred_element_type=jnp.float32))
    attn = jnp.concatenate(heads, axis=-1)                     # (S, H)
    x = x + _mm(attn, wo_ref[0])

    # ----- mlp sub-block: x + down(silu(gate(x)) * up(x)) -----
    gx2 = _rmsnorm(x, rn2_ref[0])
    gu = _mm(gx2, wgu_ref[0])                                  # (S, 2I) lane-dense
    gate = gu[:, :INTERMEDIATE_SIZE]
    up = gu[:, INTERMEDIATE_SIZE:]
    act = gate * jax.nn.sigmoid(gate)                          # SiLU
    x = x + _mm(act * up, wd_ref[0])

    h_ref[...] = x
    stack_ref[li + 1] = x                # layers_output[li + 1]

    @pl.when(li == pl.num_programs(0) - 1)
    def _():
        final_ref[...] = _rmsnorm(x, rmsw_ref[...])            # final model.norm


# ------------------------------- wrapper -----------------------------------
def _const_spec(shape):
    zeros = (0,) * len(shape)
    return pl.BlockSpec(shape, lambda i: zeros)


def _layer_spec(shape):                  # leading dim selects the layer
    zeros = (0,) * (len(shape) - 1)
    return pl.BlockSpec(shape, lambda i: (i,) + zeros)


@jax.jit
def model_forward(input_ids, params):
    (embed, rn1_all, wqkv_all, wo_all, rn2_all, wgu_all, wd_all, rms_w,
     cos_full, sin_full, rot_p, mask_add) = params

    hidden = jnp.take(embed, input_ids, axis=0)   # embedding lookup (glue)

    grid_spec = pltpu.PrefetchScalarGridSpec(
        num_scalar_prefetch=0,
        grid=(NUM_LAYERS,),
        in_specs=[
            _const_spec((SEQ_LEN, HIDDEN_SIZE)),                    # embeddings
            _const_spec((SEQ_LEN, SEQ_LEN)),                        # causal mask
            _const_spec((SEQ_LEN, HIDDEN_SIZE)),                    # cos
            _const_spec((SEQ_LEN, HIDDEN_SIZE)),                    # sin
            _const_spec((HIDDEN_SIZE, HIDDEN_SIZE)),                # rotate_half P
            _layer_spec((1, 1, HIDDEN_SIZE)),                       # rn1
            _layer_spec((1, HIDDEN_SIZE, 3 * HIDDEN_SIZE)),         # wqkv
            _layer_spec((1, HIDDEN_SIZE, HIDDEN_SIZE)),             # wo
            _layer_spec((1, 1, HIDDEN_SIZE)),                       # rn2
            _layer_spec((1, HIDDEN_SIZE, 2 * INTERMEDIATE_SIZE)),   # wgu
            _layer_spec((1, INTERMEDIATE_SIZE, HIDDEN_SIZE)),       # wd
            _const_spec((1, HIDDEN_SIZE)),                          # final rms w
        ],
        out_specs=[
            _const_spec((SEQ_LEN, HIDDEN_SIZE)),                    # final output
            _const_spec((NUM_LAYERS + 1, SEQ_LEN, HIDDEN_SIZE)),    # layers stack
        ],
        scratch_shapes=[pltpu.VMEM((SEQ_LEN, HIDDEN_SIZE), jnp.float32)],
    )

    final_out, layers_stack = pl.pallas_call(
        fused_model_kernel,
        out_shape=(
            jax.ShapeDtypeStruct((SEQ_LEN, HIDDEN_SIZE), jnp.float32),
            jax.ShapeDtypeStruct((NUM_LAYERS + 1, SEQ_LEN, HIDDEN_SIZE),
                                 jnp.float32),
        ),
        grid_spec=grid_spec,
        compiler_params=pltpu.CompilerParams(
            dimension_semantics=("arbitrary",)),   # layers are sequential
    )(hidden, mask_add, cos_full, sin_full, rot_p,
      rn1_all, wqkv_all, wo_all, rn2_all, wgu_all, wd_all, rms_w)
    return final_out, layers_stack


# ------------------------- parameter construction --------------------------
def rope_tables(seq_len, head_dim, base=ROPE_BASE):
    inv_freq = 1.0 / (base ** (np.arange(0, head_dim, 2, dtype=np.float32) / head_dim))
    pos = np.arange(seq_len, dtype=np.float32)
    angles = pos[:, None] * inv_freq[None, :]                # (S, head_dim//2)
    emb = np.concatenate([angles, angles], axis=-1)          # (S, head_dim)
    cos = np.tile(np.cos(emb), (1, NUM_HEADS))               # (S, HIDDEN)
    sin = np.tile(np.sin(emb), (1, NUM_HEADS))
    return jnp.asarray(cos), jnp.asarray(sin)


def rotate_half_matrix():
    """(H,H) matrix P so that, per head, t @ P == concat([-t2, t1])."""
    half = HEAD_DIM // 2
    p = np.zeros((HIDDEN_SIZE, HIDDEN_SIZE), np.float32)
    for h in range(NUM_HEADS):
        b = h * HEAD_DIM
        for c in range(half):
            p[b + half + c, b + c] = -1.0
            p[b + c, b + half + c] = 1.0
    return jnp.asarray(p)


def causal_mask_add():
    r = np.arange(SEQ_LEN)
    m = np.where(r[None, :] <= r[:, None], 0.0, -1e30).astype(np.float32)
    return jnp.asarray(m)


def init_params(key):
    def normal(k, shape):
        return 0.02 * jax.random.normal(k, shape, dtype=jnp.float32)

    keys = jax.random.split(key, 1 + 7 * NUM_LAYERS)
    embed = normal(keys[0], (VOCAB_SIZE, HIDDEN_SIZE))

    scale = 1.0 / math.sqrt(HEAD_DIM)
    rn1_l, wqkv_l, wo_l, rn2_l, wgu_l, wd_l = [], [], [], [], [], []
    ki = 1
    for _ in range(NUM_LAYERS):
        # torch nn.Linear weight is [out, in]; store transposed [in, out].
        # 1/sqrt(head_dim) attention scale is folded into Wq (RoPE is linear).
        wq = normal(keys[ki + 0], (HIDDEN_SIZE, HIDDEN_SIZE)) * scale
        wk = normal(keys[ki + 1], (HIDDEN_SIZE, HIDDEN_SIZE))
        wv = normal(keys[ki + 2], (HIDDEN_SIZE, HIDDEN_SIZE))
        wo = normal(keys[ki + 3], (HIDDEN_SIZE, HIDDEN_SIZE))
        wg = normal(keys[ki + 4], (HIDDEN_SIZE, INTERMEDIATE_SIZE))
        wu = normal(keys[ki + 5], (HIDDEN_SIZE, INTERMEDIATE_SIZE))
        wd = normal(keys[ki + 6], (INTERMEDIATE_SIZE, HIDDEN_SIZE))
        ki += 7
        rn1_l.append(jnp.ones((1, HIDDEN_SIZE), jnp.float32))
        rn2_l.append(jnp.ones((1, HIDDEN_SIZE), jnp.float32))
        wqkv_l.append(jnp.concatenate([wq, wk, wv], axis=1))      # (H, 3H)
        wo_l.append(wo)
        wgu_l.append(jnp.concatenate([wg, wu], axis=1))           # (H, 2I)
        wd_l.append(wd)

    rms_w = jnp.ones((1, HIDDEN_SIZE), jnp.float32)
    cos_full, sin_full = rope_tables(SEQ_LEN, HEAD_DIM)
    rot_p = rotate_half_matrix()
    mask_add = causal_mask_add()

    return (embed,
            jnp.stack(rn1_l), jnp.stack(wqkv_l), jnp.stack(wo_l),
            jnp.stack(rn2_l), jnp.stack(wgu_l), jnp.stack(wd_l),
            rms_w, cos_full, sin_full, rot_p, mask_add)


if __name__ == "__main__":
    key = jax.random.PRNGKey(0)
    k_param, k_ids = jax.random.split(key)
    params = init_params(k_param)
    input_ids = jax.random.randint(k_ids, (SEQ_LEN,), 0, VOCAB_SIZE,
                                   dtype=jnp.int32)

    final_out, layers_stack = model_forward(input_ids, params)
    jax.block_until_ready((final_out, layers_stack))

    assert final_out.shape == (SEQ_LEN, HIDDEN_SIZE)
    assert layers_stack.shape == (NUM_LAYERS + 1, SEQ_LEN, HIDDEN_SIZE)
    assert bool(jnp.all(jnp.isfinite(final_out)))
    print("KERNEL_OK")
</pallas_src>

<mosaic_0001>
module attributes {stable_mosaic.version = 11 : i64} {
  func.func @fused_model_kernel(%arg0: i32, %arg1: memref<8x32xf32, #tpu.memory_space<vmem>>, %arg2: memref<8x8xf32, #tpu.memory_space<vmem>>, %arg3: memref<8x32xf32, #tpu.memory_space<vmem>>, %arg4: memref<8x32xf32, #tpu.memory_space<vmem>>, %arg5: memref<32x32xf32, #tpu.memory_space<vmem>>, %arg6: memref<1x1x32xf32, #tpu.memory_space<vmem>>, %arg7: memref<1x32x96xf32, #tpu.memory_space<vmem>>, %arg8: memref<1x32x32xf32, #tpu.memory_space<vmem>>, %arg9: memref<1x1x32xf32, #tpu.memory_space<vmem>>, %arg10: memref<1x32x128xf32, #tpu.memory_space<vmem>>, %arg11: memref<1x64x32xf32, #tpu.memory_space<vmem>>, %arg12: memref<1x32xf32, #tpu.memory_space<vmem>>, %arg13: memref<8x32xf32, #tpu.memory_space<vmem>>, %arg14: memref<3x8x32xf32, #tpu.memory_space<vmem>>, %arg15: memref<8x32xf32, #tpu.memory_space<vmem>>) attributes {dimension_semantics = [#tpu.dimension_semantics<arbitrary>], iteration_bounds = array<i64: 2>, scalar_prefetch = 0 : i64, scratch_operands = 1 : i64, tpu.core_type = #tpu.core_type<tc>, window_params = [{pipeline_mode = #tpu.pipeline_mode<synchronous>, transform_indices = @transform_0, window_bounds = array<i64: 8, 32>}, {pipeline_mode = #tpu.pipeline_mode<synchronous>, transform_indices = @transform_1, window_bounds = array<i64: 8, 8>}, {pipeline_mode = #tpu.pipeline_mode<synchronous>, transform_indices = @transform_2, window_bounds = array<i64: 8, 32>}, {pipeline_mode = #tpu.pipeline_mode<synchronous>, transform_indices = @transform_3, window_bounds = array<i64: 8, 32>}, {pipeline_mode = #tpu.pipeline_mode<synchronous>, transform_indices = @transform_4, window_bounds = array<i64: 32, 32>}, {transform_indices = @transform_5, window_bounds = array<i64: 1, 1, 32>}, {transform_indices = @transform_6, window_bounds = array<i64: 1, 32, 96>}, {transform_indices = @transform_7, window_bounds = array<i64: 1, 32, 32>}, {transform_indices = @transform_8, window_bounds = array<i64: 1, 1, 32>}, {transform_indices = @transform_9, window_bounds = array<i64: 1, 32, 128>}, {transform_indices = @transform_10, window_bounds = array<i64: 1, 64, 32>}, {pipeline_mode = #tpu.pipeline_mode<synchronous>, transform_indices = @transform_11, window_bounds = array<i64: 1, 32>}, {pipeline_mode = #tpu.pipeline_mode<synchronous>, transform_indices = @transform_12, window_bounds = array<i64: 8, 32>}, {pipeline_mode = #tpu.pipeline_mode<synchronous>, transform_indices = @transform_13, window_bounds = array<i64: 3, 8, 32>}]} {
    %c0_i32 = arith.constant 0 : i32
    %0 = arith.cmpi eq, %arg0, %c0_i32 : i32
    %1 = arith.extui %0 : i1 to i32
    %c0_i32_0 = arith.constant 0 : i32
    %2 = arith.cmpi ne, %1, %c0_i32_0 : i32
    scf.if %2 {
      %c0_62 = arith.constant 0 : index
      %c0_63 = arith.constant 0 : index
      %144 = vector.load %arg1[%c0_62, %c0_63] : memref<8x32xf32, #tpu.memory_space<vmem>>, vector<8x32xf32>
      %c0_64 = arith.constant 0 : index
      %c0_65 = arith.constant 0 : index
      %145 = vector.load %arg15[%c0_64, %c0_65] : memref<8x32xf32, #tpu.memory_space<vmem>>, vector<8x32xf32>
      tpu.vector_store %arg15[%c0_64, %c0_65], %144 {strides = array<i32>} : memref<8x32xf32, #tpu.memory_space<vmem>>, vector<8x32xf32>,
      %c0_66 = arith.constant 0 : index
      %c0_67 = arith.constant 0 : index
      %146 = vector.load %arg1[%c0_66, %c0_67] : memref<8x32xf32, #tpu.memory_space<vmem>>, vector<8x32xf32>
      %c0_68 = arith.constant 0 : index
      %c0_69 = arith.constant 0 : index
      %c0_70 = arith.constant 0 : index
      %147 = vector.load %arg14[%c0_68, %c0_69, %c0_70] : memref<3x8x32xf32, #tpu.memory_space<vmem>>, vector<1x8x32xf32>
      %148 = vector.shape_cast %147 : vector<1x8x32xf32> to vector<8x32xf32>
      %149 = vector.shape_cast %146 : vector<8x32xf32> to vector<1x8x32xf32>
      tpu.vector_store %arg14[%c0_68, %c0_69, %c0_70], %149 {strides = array<i32>} : memref<3x8x32xf32, #tpu.memory_space<vmem>>, vector<1x8x32xf32>,
    } else {
    }
    %c0 = arith.constant 0 : index
    %c0_1 = arith.constant 0 : index
    %3 = vector.load %arg15[%c0, %c0_1] : memref<8x32xf32, #tpu.memory_space<vmem>>, vector<8x32xf32>
    %c0_2 = arith.constant 0 : index
    %c0_3 = arith.constant 0 : index
    %4 = vector.load %arg3[%c0_2, %c0_3] : memref<8x32xf32, #tpu.memory_space<vmem>>, vector<8x32xf32>
    %c0_4 = arith.constant 0 : index
    %c0_5 = arith.constant 0 : index
    %5 = vector.load %arg4[%c0_4, %c0_5] : memref<8x32xf32, #tpu.memory_space<vmem>>, vector<8x32xf32>
    %c0_6 = arith.constant 0 : index
    %c0_7 = arith.constant 0 : index
    %6 = vector.load %arg2[%c0_6, %c0_7] : memref<8x8xf32, #tpu.memory_space<vmem>>, vector<8x8xf32>
    %c0_8 = arith.constant 0 : index
    %c0_9 = arith.constant 0 : index
    %7 = vector.load %arg5[%c0_8, %c0_9] : memref<32x32xf32, #tpu.memory_space<vmem>>, vector<32x32xf32>
    %c0_10 = arith.constant 0 : index
    %c0_11 = arith.constant 0 : index
    %c0_12 = arith.constant 0 : index
    %8 = vector.load %arg6[%c0_10, %c0_11, %c0_12] : memref<1x1x32xf32, #tpu.memory_space<vmem>>, vector<1x1x32xf32>
    %9 = vector.shape_cast %8 : vector<1x1x32xf32> to vector<1x32xf32>
    %10 = arith.mulf %3, %3 : vector<8x32xf32>
    %cst = arith.constant dense<0.000000e+00> : vector<8xf32>
    %11 = vector.multi_reduction <add>, %10, %cst [1] : vector<8x32xf32> to vector<8xf32>
    %12 = vector.shape_cast %11 : vector<8xf32> to vector<8x1xf32>
    %cst_13 = arith.constant 3.200000e+01 : f32
    %13 = vector.broadcast %cst_13 : f32 to vector<8x1xf32>
    %14 = arith.divf %12, %13 : vector<8x1xf32>
    %cst_14 = arith.constant 9.99999997E-7 : f32
    %15 = vector.broadcast %cst_14 : f32 to vector<8x1xf32>
    %16 = arith.addf %14, %15 : vector<8x1xf32>
    %17 = math.rsqrt %16 : vector<8x1xf32>
    %18 = vector.broadcast %17 : vector<8x1xf32> to vector<8x32xf32>
    %19 = arith.mulf %3, %18 : vector<8x32xf32>
    %20 = vector.broadcast %9 : vector<1x32xf32> to vector<8x32xf32>
    %21 = arith.mulf %19, %20 : vector<8x32xf32>
    %c0_15 = arith.constant 0 : index
    %c0_16 = arith.constant 0 : index
    %c0_17 = arith.constant 0 : index
    %22 = vector.load %arg7[%c0_15, %c0_16, %c0_17] : memref<1x32x96xf32, #tpu.memory_space<vmem>>, vector<1x32x96xf32>
    %23 = vector.shape_cast %22 : vector<1x32x96xf32> to vector<32x96xf32>
    %cst_18 = arith.constant dense<0.000000e+00> : vector<8x96xf32>
    %24 = tpu.matmul %21, %23, %cst_18 {dimension_numbers = #tpu.dot_dimension_numbers<[1], [0], [0], [1], [0, 0, 1, 1], [], []>} : vector<8x32xf32>, vector<32x96xf32>, vector<8x96xf32> -> vector<8x96xf32>
    %25 = vector.extract_strided_slice %24 {offsets = [0, 0], sizes = [8, 32], strides = [1, 1]} : vector<8x96xf32> to vector<8x32xf32>
    %26 = vector.extract_strided_slice %24 {offsets = [0, 32], sizes = [8, 32], strides = [1, 1]} : vector<8x96xf32> to vector<8x32xf32>
    %27 = vector.extract_strided_slice %24 {offsets = [0, 64], sizes = [8, 32], strides = [1, 1]} : vector<8x96xf32> to vector<8x32xf32>
    %28 = arith.mulf %25, %4 : vector<8x32xf32>
    %cst_19 = arith.constant dense<0.000000e+00> : vector<8x32xf32>
    %29 = tpu.matmul %25, %7, %cst_19 {dimension_numbers = #tpu.dot_dimension_numbers<[1], [0], [0], [1], [0, 0, 1, 1], [], []>} : vector<8x32xf32>, vector<32x32xf32>, vector<8x32xf32> -> vector<8x32xf32>
    %30 = arith.mulf %29, %5 : vector<8x32xf32>
    %31 = arith.addf %28, %30 : vector<8x32xf32>
    %32 = arith.mulf %26, %4 : vector<8x32xf32>
    %cst_20 = arith.constant dense<0.000000e+00> : vector<8x32xf32>
    %33 = tpu.matmul %26, %7, %cst_20 {dimension_numbers = #tpu.dot_dimension_numbers<[1], [0], [0], [1], [0, 0, 1, 1], [], []>} : vector<8x32xf32>, vector<32x32xf32>, vector<8x32xf32> -> vector<8x32xf32>
    %34 = arith.mulf %33, %5 : vector<8x32xf32>
    %35 = arith.addf %32, %34 : vector<8x32xf32>
    %36 = vector.extract_strided_slice %31 {offsets = [0, 0], sizes = [8, 8], strides = [1, 1]} : vector<8x32xf32> to vector<8x8xf32>
    %37 = vector.extract_strided_slice %35 {offsets = [0, 0], sizes = [8, 8], strides = [1, 1]} : vector<8x32xf32> to vector<8x8xf32>
    %38 = vector.extract_strided_slice %27 {offsets = [0, 0], sizes = [8, 8], strides = [1, 1]} : vector<8x32xf32> to vector<8x8xf32>
    %cst_21 = arith.constant dense<0.000000e+00> : vector<8x8xf32>
    %39 = tpu.matmul %36, %37, %cst_21 {dimension_numbers = #tpu.dot_dimension_numbers<[1], [1], [0], [0], [0, 0, 1, 0], [], []>} : vector<8x8xf32>, vector<8x8xf32>, vector<8x8xf32> -> vector<8x8xf32>
    %40 = arith.addf %39, %6 : vector<8x8xf32>
    %cst_22 = arith.constant dense<0xFF800000> : vector<8xf32>
    %41 = vector.multi_reduction <maximumf>, %40, %cst_22 [1] : vector<8x8xf32> to vector<8xf32>
    %42 = vector.shape_cast %41 : vector<8xf32> to vector<8x1xf32>
    %43 = vector.broadcast %42 : vector<8x1xf32> to vector<8x8xf32>
    %44 = arith.subf %40, %43 : vector<8x8xf32>
    %45 = math.exp %44 : vector<8x8xf32>
    %cst_23 = arith.constant dense<0.000000e+00> : vector<8xf32>
    %46 = vector.multi_reduction <add>, %45, %cst_23 [1] : vector<8x8xf32> to vector<8xf32>
    %47 = vector.shape_cast %46 : vector<8xf32> to vector<8x1xf32>
    %48 = tpu.reciprocal %47 {approx = true} : vector<8x1xf32> -> vector<8x1xf32>
    %49 = vector.broadcast %48 : vector<8x1xf32> to vector<8x8xf32>
    %50 = arith.mulf %45, %49 : vector<8x8xf32>
    %cst_24 = arith.constant dense<0.000000e+00> : vector<8x8xf32>
    %51 = tpu.matmul %50, %38, %cst_24 {dimension_numbers = #tpu.dot_dimension_numbers<[1], [0], [0], [1], [0, 0, 1, 1], [], []>} : vector<8x8xf32>, vector<8x8xf32>, vector<8x8xf32> -> vector<8x8xf32>
    %52 = vector.extract_strided_slice %31 {offsets = [0, 8], sizes = [8, 8], strides = [1, 1]} : vector<8x32xf32> to vector<8x8xf32>
    %53 = vector.extract_strided_slice %35 {offsets = [0, 8], sizes = [8, 8], strides = [1, 1]} : vector<8x32xf32> to vector<8x8xf32>
    %54 = vector.extract_strided_slice %27 {offsets = [0, 8], sizes = [8, 8], strides = [1, 1]} : vector<8x32xf32> to vector<8x8xf32>
    %cst_25 = arith.constant dense<0.000000e+00> : vector<8x8xf32>
    %55 = tpu.matmul %52, %53, %cst_25 {dimension_numbers = #tpu.dot_dimension_numbers<[1], [1], [0], [0], [0, 0, 1, 0], [], []>} : vector<8x8xf32>, vector<8x8xf32>, vector<8x8xf32> -> vector<8x8xf32>
    %56 = arith.addf %55, %6 : vector<8x8xf32>
    %cst_26 = arith.constant dense<0xFF800000> : vector<8xf32>
    %57 = vector.multi_reduction <maximumf>, %56, %cst_26 [1] : vector<8x8xf32> to vector<8xf32>
    %58 = vector.shape_cast %57 : vector<8xf32> to vector<8x1xf32>
    %59 = vector.broadcast %58 : vector<8x1xf32> to vector<8x8xf32>
    %60 = arith.subf %56, %59 : vector<8x8xf32>
    %61 = math.exp %60 : vector<8x8xf32>
    %cst_27 = arith.constant dense<0.000000e+00> : vector<8xf32>
    %62 = vector.multi_reduction <add>, %61, %cst_27 [1] : vector<8x8xf32> to vector<8xf32>
    %63 = vector.shape_cast %62 : vector<8xf32> to vector<8x1xf32>
    %64 = tpu.reciprocal %63 {approx = true} : vector<8x1xf32> -> vector<8x1xf32>
    %65 = vector.broadcast %64 : vector<8x1xf32> to vector<8x8xf32>
    %66 = arith.mulf %61, %65 : vector<8x8xf32>
    %cst_28 = arith.constant dense<0.000000e+00> : vector<8x8xf32>
    %67 = tpu.matmul %66, %54, %cst_28 {dimension_numbers = #tpu.dot_dimension_numbers<[1], [0], [0], [1], [0, 0, 1, 1], [], []>} : vector<8x8xf32>, vector<8x8xf32>, vector<8x8xf32> -> vector<8x8xf32>
    %68 = vector.extract_strided_slice %31 {offsets = [0, 16], sizes = [8, 8], strides = [1, 1]} : vector<8x32xf32> to vector<8x8xf32>
    %69 = vector.extract_strided_slice %35 {offsets = [0, 16], sizes = [8, 8], strides = [1, 1]} : vector<8x32xf32> to vector<8x8xf32>
    %70 = vector.extract_strided_slice %27 {offsets = [0, 16], sizes = [8, 8], strides = [1, 1]} : vector<8x32xf32> to vector<8x8xf32>
    %cst_29 = arith.constant dense<0.000000e+00> : vector<8x8xf32>
    %71 = tpu.matmul %68, %69, %cst_29 {dimension_numbers = #tpu.dot_dimension_numbers<[1], [1], [0], [0], [0, 0, 1, 0], [], []>} : vector<8x8xf32>, vector<8x8xf32>, vector<8x8xf32> -> vector<8x8xf32>
    %72 = arith.addf %71, %6 : vector<8x8xf32>
    %cst_30 = arith.constant dense<0xFF800000> : vector<8xf32>
    %73 = vector.multi_reduction <maximumf>, %72, %cst_30 [1] : vector<8x8xf32> to vector<8xf32>
    %74 = vector.shape_cast %73 : vector<8xf32> to vector<8x1xf32>
    %75 = vector.broadcast %74 : vector<8x1xf32> to vector<8x8xf32>
    %76 = arith.subf %72, %75 : vector<8x8xf32>
    %77 = math.exp %76 : vector<8x8xf32>
    %cst_31 = arith.constant dense<0.000000e+00> : vector<8xf32>
    %78 = vector.multi_reduction <add>, %77, %cst_31 [1] : vector<8x8xf32> to vector<8xf32>
    %79 = vector.shape_cast %78 : vector<8xf32> to vector<8x1xf32>
    %80 = tpu.reciprocal %79 {approx = true} : vector<8x1xf32> -> vector<8x1xf32>
    %81 = vector.broadcast %80 : vector<8x1xf32> to vector<8x8xf32>
    %82 = arith.mulf %77, %81 : vector<8x8xf32>
    %cst_32 = arith.constant dense<0.000000e+00> : vector<8x8xf32>
    %83 = tpu.matmul %82, %70, %cst_32 {dimension_numbers = #tpu.dot_dimension_numbers<[1], [0], [0], [1], [0, 0, 1, 1], [], []>} : vector<8x8xf32>, vector<8x8xf32>, vector<8x8xf32> -> vector<8x8xf32>
    %84 = vector.extract_strided_slice %31 {offsets = [0, 24], sizes = [8, 8], strides = [1, 1]} : vector<8x32xf32> to vector<8x8xf32>
    %85 = vector.extract_strided_slice %35 {offsets = [0, 24], sizes = [8, 8], strides = [1, 1]} : vector<8x32xf32> to vector<8x8xf32>
    %86 = vector.extract_strided_slice %27 {offsets = [0, 24], sizes = [8, 8], strides = [1, 1]} : vector<8x32xf32> to vector<8x8xf32>
    %cst_33 = arith.constant dense<0.000000e+00> : vector<8x8xf32>
    %87 = tpu.matmul %84, %85, %cst_33 {dimension_numbers = #tpu.dot_dimension_numbers<[1], [1], [0], [0], [0, 0, 1, 0], [], []>} : vector<8x8xf32>, vector<8x8xf32>, vector<8x8xf32> -> vector<8x8xf32>
    %88 = arith.addf %87, %6 : vector<8x8xf32>
    %cst_34 = arith.constant dense<0xFF800000> : vector<8xf32>
    %89 = vector.multi_reduction <maximumf>, %88, %cst_34 [1] : vector<8x8xf32> to vector<8xf32>
    %90 = vector.shape_cast %89 : vector<8xf32> to vector<8x1xf32>
    %91 = vector.broadcast %90 : vector<8x1xf32> to vector<8x8xf32>
    %92 = arith.subf %88, %91 : vector<8x8xf32>
    %93 = math.exp %92 : vector<8x8xf32>
    %cst_35 = arith.constant dense<0.000000e+00> : vector<8xf32>
    %94 = vector.multi_reduction <add>, %93, %cst_35 [1] : vector<8x8xf32> to vector<8xf32>
    %95 = vector.shape_cast %94 : vector<8xf32> to vector<8x1xf32>
    %96 = tpu.reciprocal %95 {approx = true} : vector<8x1xf32> -> vector<8x1xf32>
    %97 = vector.broadcast %96 : vector<8x1xf32> to vector<8x8xf32>
    %98 = arith.mulf %93, %97 : vector<8x8xf32>
    %cst_36 = arith.constant dense<0.000000e+00> : vector<8x8xf32>
    %99 = tpu.matmul %98, %86, %cst_36 {dimension_numbers = #tpu.dot_dimension_numbers<[1], [0], [0], [1], [0, 0, 1, 1], [], []>} : vector<8x8xf32>, vector<8x8xf32>, vector<8x8xf32> -> vector<8x8xf32>
    %100 = tpu.concatenate %51, %67, %83, %99 in 1 : vector<8x8xf32>, vector<8x8xf32>, vector<8x8xf32>, vector<8x8xf32> -> vector<8x32xf32>
    %c0_37 = arith.constant 0 : index
    %c0_38 = arith.constant 0 : index
    %c0_39 = arith.constant 0 : index
    %101 = vector.load %arg8[%c0_37, %c0_38, %c0_39] : memref<1x32x32xf32, #tpu.memory_space<vmem>>, vector<1x32x32xf32>
    %102 = vector.shape_cast %101 : vector<1x32x32xf32> to vector<32x32xf32>
    %cst_40 = arith.constant dense<0.000000e+00> : vector<8x32xf32>
    %103 = tpu.matmul %100, %102, %cst_40 {dimension_numbers = #tpu.dot_dimension_numbers<[1], [0], [0], [1], [0, 0, 1, 1], [], []>} : vector<8x32xf32>, vector<32x32xf32>, vector<8x32xf32> -> vector<8x32xf32>
    %104 = arith.addf %3, %103 : vector<8x32xf32>
    %c0_41 = arith.constant 0 : index
    %c0_42 = arith.constant 0 : index
    %c0_43 = arith.constant 0 : index
    %105 = vector.load %arg9[%c0_41, %c0_42, %c0_43] : memref<1x1x32xf32, #tpu.memory_space<vmem>>, vector<1x1x32xf32>
    %106 = vector.shape_cast %105 : vector<1x1x32xf32> to vector<1x32xf32>
    %107 = arith.mulf %104, %104 : vector<8x32xf32>
    %cst_44 = arith.constant dense<0.000000e+00> : vector<8xf32>
    %108 = vector.multi_reduction <add>, %107, %cst_44 [1] : vector<8x32xf32> to vector<8xf32>
    %109 = vector.shape_cast %108 : vector<8xf32> to vector<8x1xf32>
    %cst_45 = arith.constant 3.200000e+01 : f32
    %110 = vector.broadcast %cst_45 : f32 to vector<8x1xf32>
    %111 = arith.divf %109, %110 : vector<8x1xf32>
    %cst_46 = arith.constant 9.99999997E-7 : f32
    %112 = vector.broadcast %cst_46 : f32 to vector<8x1xf32>
    %113 = arith.addf %111, %112 : vector<8x1xf32>
    %114 = math.rsqrt %113 : vector<8x1xf32>
    %115 = vector.broadcast %114 : vector<8x1xf32> to vector<8x32xf32>
    %116 = arith.mulf %104, %115 : vector<8x32xf32>
    %117 = vector.broadcast %106 : vector<1x32xf32> to vector<8x32xf32>
    %118 = arith.mulf %116, %117 : vector<8x32xf32>
    %c0_47 = arith.constant 0 : index
    %c0_48 = arith.constant 0 : index
    %c0_49 = arith.constant 0 : index
    %119 = vector.load %arg10[%c0_47, %c0_48, %c0_49] : memref<1x32x128xf32, #tpu.memory_space<vmem>>, vector<1x32x128xf32>
    %120 = vector.shape_cast %119 : vector<1x32x128xf32> to vector<32x128xf32>
    %cst_50 = arith.constant dense<0.000000e+00> : vector<8x128xf32>
    %121 = tpu.matmul %118, %120, %cst_50 {dimension_numbers = #tpu.dot_dimension_numbers<[1], [0], [0], [1], [0, 0, 1, 1], [], []>} : vector<8x32xf32>, vector<32x128xf32>, vector<8x128xf32> -> vector<8x128xf32>
    %122 = vector.extract_strided_slice %121 {offsets = [0, 0], sizes = [8, 64], strides = [1, 1]} : vector<8x128xf32> to vector<8x64xf32>
    %123 = vector.extract_strided_slice %121 {offsets = [0, 64], sizes = [8, 64], strides = [1, 1]} : vector<8x128xf32> to vector<8x64xf32>
    %124 = arith.negf %122 : vector<8x64xf32>
    %125 = math.exp %124 : vector<8x64xf32>
    %cst_51 = arith.constant 1.000000e+00 : f32
    %126 = vector.broadcast %cst_51 : f32 to vector<8x64xf32>
    %127 = arith.addf %126, %125 : vector<8x64xf32>
    %128 = arith.divf %126, %127 : vector<8x64xf32>
    %129 = arith.mulf %122, %128 : vector<8x64xf32>
    %130 = arith.mulf %129, %123 : vector<8x64xf32>
    %c0_52 = arith.constant 0 : index
    %c0_53 = arith.constant 0 : index
    %c0_54 = arith.constant 0 : index
    %131 = vector.load %arg11[%c0_52, %c0_53, %c0_54] : memref<1x64x32xf32, #tpu.memory_space<vmem>>, vector<1x64x32xf32>
    %132 = vector.shape_cast %131 : vector<1x64x32xf32> to vector<64x32xf32>
    %cst_55 = arith.constant dense<0.000000e+00> : vector<8x32xf32>
    %133 = tpu.matmul %130, %132, %cst_55 {dimension_numbers = #tpu.dot_dimension_numbers<[1], [0], [0], [1], [0, 0, 1, 1], [], []>} : vector<8x64xf32>, vector<64x32xf32>, vector<8x32xf32> -> vector<8x32xf32>
    %134 = arith.addf %104, %133 : vector<8x32xf32>
    %c0_56 = arith.constant 0 : index
    %c0_57 = arith.constant 0 : index
    %135 = vector.load %arg15[%c0_56, %c0_57] : memref<8x32xf32, #tpu.memory_space<vmem>>, vector<8x32xf32>
    tpu.vector_store %arg15[%c0_56, %c0_57], %134 {strides = array<i32>} : memref<8x32xf32, #tpu.memory_space<vmem>>, vector<8x32xf32>,
    %c1_i32 = arith.constant 1 : i32
    %136 = arith.addi %arg0, %c1_i32 : i32
    %137 = arith.index_cast %136 : i32 to index
    %c0_58 = arith.constant 0 : index
    %c0_59 = arith.constant 0 : index
    %138 = vector.load %arg14[%137, %c0_58, %c0_59] : memref<3x8x32xf32, #tpu.memory_space<vmem>>, vector<1x8x32xf32>
    %139 = vector.shape_cast %138 : vector<1x8x32xf32> to vector<8x32xf32>
    %140 = vector.shape_cast %134 : vector<8x32xf32> to vector<1x8x32xf32>
    tpu.vector_store %arg14[%137, %c0_58, %c0_59], %140 {strides = array<i32>} : memref<3x8x32xf32, #tpu.memory_space<vmem>>, vector<1x8x32xf32>,
    %c1_i32_60 = arith.constant 1 : i32
    %141 = arith.cmpi eq, %arg0, %c1_i32_60 : i32
    %142 = arith.extui %141 : i1 to i32
    %c0_i32_61 = arith.constant 0 : i32
    %143 = arith.cmpi ne, %142, %c0_i32_61 : i32
    scf.if %143 {
      %c0_62 = arith.constant 0 : index
      %c0_63 = arith.constant 0 : index
      %144 = vector.load %arg12[%c0_62, %c0_63] : memref<1x32xf32, #tpu.memory_space<vmem>>, vector<1x32xf32>
      %145 = arith.mulf %134, %134 : vector<8x32xf32>
      %cst_64 = arith.constant dense<0.000000e+00> : vector<8xf32>
      %146 = vector.multi_reduction <add>, %145, %cst_64 [1] : vector<8x32xf32> to vector<8xf32>
      %147 = vector.shape_cast %146 : vector<8xf32> to vector<8x1xf32>
      %cst_65 = arith.constant 3.200000e+01 : f32
      %148 = vector.broadcast %cst_65 : f32 to vector<8x1xf32>
      %149 = arith.divf %147, %148 : vector<8x1xf32>
      %cst_66 = arith.constant 9.99999997E-7 : f32
      %150 = vector.broadcast %cst_66 : f32 to vector<8x1xf32>
      %151 = arith.addf %149, %150 : vector<8x1xf32>
      %152 = math.rsqrt %151 : vector<8x1xf32>
      %153 = vector.broadcast %152 : vector<8x1xf32> to vector<8x32xf32>
      %154 = arith.mulf %134, %153 : vector<8x32xf32>
      %155 = vector.broadcast %144 : vector<1x32xf32> to vector<8x32xf32>
      %156 = arith.mulf %154, %155 : vector<8x32xf32>
      %c0_67 = arith.constant 0 : index
      %c0_68 = arith.constant 0 : index
      %157 = vector.load %arg13[%c0_67, %c0_68] : memref<8x32xf32, #tpu.memory_space<vmem>>, vector<8x32xf32>
      tpu.vector_store %arg13[%c0_67, %c0_68], %156 {strides = array<i32>} : memref<8x32xf32, #tpu.memory_space<vmem>>, vector<8x32xf32>,
    } else {
    }
    return
  }
  func.func @transform_0(%arg0: i32) -> (i32, i32) {
    %c0_i32 = arith.constant 0 : i32
    %c0_i32_0 = arith.constant 0 : i32
    %c0_i32_1 = arith.constant 0 : i32
    return %c0_i32, %c0_i32_0 : i32, i32
  }
  func.func @transform_1(%arg0: i32) -> (i32, i32) {
    %c0_i32 = arith.constant 0 : i32
    %c0_i32_0 = arith.constant 0 : i32
    %c0_i32_1 = arith.constant 0 : i32
    return %c0_i32, %c0_i32_0 : i32, i32
  }
  func.func @transform_2(%arg0: i32) -> (i32, i32) {
    %c0_i32 = arith.constant 0 : i32
    %c0_i32_0 = arith.constant 0 : i32
    %c0_i32_1 = arith.constant 0 : i32
    return %c0_i32, %c0_i32_0 : i32, i32
  }
  func.func @transform_3(%arg0: i32) -> (i32, i32) {
    %c0_i32 = arith.constant 0 : i32
    %c0_i32_0 = arith.constant 0 : i32
    %c0_i32_1 = arith.constant 0 : i32
    return %c0_i32, %c0_i32_0 : i32, i32
  }
  func.func @transform_4(%arg0: i32) -> (i32, i32) {
    %c0_i32 = arith.constant 0 : i32
    %c0_i32_0 = arith.constant 0 : i32
    %c0_i32_1 = arith.constant 0 : i32
    return %c0_i32, %c0_i32_0 : i32, i32
  }
  func.func @transform_5(%arg0: i32) -> (i32, i32, i32) {
    %c0_i32 = arith.constant 0 : i32
    %c0_i32_0 = arith.constant 0 : i32
    %c0_i32_1 = arith.constant 0 : i32
    return %arg0, %c0_i32, %c0_i32_0 : i32, i32, i32
  }
  func.func @transform_6(%arg0: i32) -> (i32, i32, i32) {
    %c0_i32 = arith.constant 0 : i32
    %c0_i32_0 = arith.constant 0 : i32
    %c0_i32_1 = arith.constant 0 : i32
    return %arg0, %c0_i32, %c0_i32_0 : i32, i32, i32
  }
  func.func @transform_7(%arg0: i32) -> (i32, i32, i32) {
    %c0_i32 = arith.constant 0 : i32
    %c0_i32_0 = arith.constant 0 : i32
    %c0_i32_1 = arith.constant 0 : i32
    return %arg0, %c0_i32, %c0_i32_0 : i32, i32, i32
  }
  func.func @transform_8(%arg0: i32) -> (i32, i32, i32) {
    %c0_i32 = arith.constant 0 : i32
    %c0_i32_0 = arith.constant 0 : i32
    %c0_i32_1 = arith.constant 0 : i32
    return %arg0, %c0_i32, %c0_i32_0 : i32, i32, i32
  }
  func.func @transform_9(%arg0: i32) -> (i32, i32, i32) {
    %c0_i32 = arith.constant 0 : i32
    %c0_i32_0 = arith.constant 0 : i32
    %c0_i32_1 = arith.constant 0 : i32
    return %arg0, %c0_i32, %c0_i32_0 : i32, i32, i32
  }
  func.func @transform_10(%arg0: i32) -> (i32, i32, i32) {
    %c0_i32 = arith.constant 0 : i32
    %c0_i32_0 = arith.constant 0 : i32
    %c0_i32_1 = arith.constant 0 : i32
    return %arg0, %c0_i32, %c0_i32_0 : i32, i32, i32
  }
  func.func @transform_11(%arg0: i32) -> (i32, i32) {
    %c0_i32 = arith.constant 0 : i32
    %c0_i32_0 = arith.constant 0 : i32
    %c0_i32_1 = arith.constant 0 : i32
    return %c0_i32, %c0_i32_0 : i32, i32
  }
  func.func @transform_12(%arg0: i32) -> (i32, i32) {
    %c0_i32 = arith.constant 0 : i32
    %c0_i32_0 = arith.constant 0 : i32
    %c0_i32_1 = arith.constant 0 : i32
    return %c0_i32, %c0_i32_0 : i32, i32
  }
  func.func @transform_13(%arg0: i32) -> (i32, i32, i32) {
    %c0_i32 = arith.constant 0 : i32
    %c0_i32_0 = arith.constant 0 : i32
    %c0_i32_1 = arith.constant 0 : i32
    %c0_i32_2 = arith.constant 0 : i32
    return %c0_i32, %c0_i32_0, %c0_i32_1 : i32, i32, i32
  }
}

</mosaic_0001>

<bundles_post_ra>
// kernel: model_forward.1
= control target key start
LH: loop header
LB: loop body
LE: loop exit
PB: predicated region body
PF: predicated region fallthrough
CT: control target
= control target key end

     0   :  { %s2614_s0 = inlined_call_operand.vmem [shape: f32[8,32], index: 0, kind: input, shape index: {}]   ;;  %s2615_s1 = inlined_call_operand.vmem [shape: f32[8,8], index: 1, kind: input, shape index: {}]   ;;  %s2616_s2 = inlined_call_operand.vmem [shape: f32[8,32], index: 2, kind: input, shape index: {}]   ;;  %s2617_s3 = inlined_call_operand.vmem [shape: f32[8,32], index: 3, kind: input, shape index: {}]   ;;  %s2618_s4 = inlined_call_operand.vmem [shape: f32[32,32], index: 4, kind: input, shape index: {}]   ;;  %s2619_s5 = inlined_call_operand.vmem [shape: f32[2,1,32], index: 5, kind: input, shape index: {}]   ;;  %s2620_s6 = inlined_call_operand.vmem [shape: f32[2,32,96], index: 6, kind: input, shape index: {}]   ;;  %s2621_s7 = inlined_call_operand.vmem [shape: f32[2,32,32], index: 7, kind: input, shape index: {}]   ;;  %s2622_s8 = inlined_call_operand.vmem [shape: f32[2,1,32], index: 8, kind: input, shape index: {}]   ;;  %s2623_s9 = inlined_call_operand.vmem [shape: f32[2,32,128], index: 9, kind: input, shape index: {}]   ;;  %s2624_s10 = inlined_call_operand.vmem [shape: f32[2,64,32], index: 10, kind: input, shape index: {}]   ;;  %s2625_s11 = inlined_call_operand.vmem [shape: f32[1,32], index: 11, kind: input, shape index: {}]   ;;  %s2626_s12 = inlined_call_operand.hbm [shape: f32[8,32], index: 12, kind: output, shape index: {0}]   ;;  %s2627_s13 = inlined_call_operand.hbm [shape: f32[3,8,32], index: 13, kind: output, shape index: {1}]  }
   0x1   :  { %2630 = sst [smem:[#allocation10_spill]] %s2627_s13 }
   0x2   :  { %19 = vsyncpa [#allocation4], 0 }
   0x3   :  { %20 = vsyncpa [#allocation6], 0  ;;  %s2364_s25 = smov 0  }
   0x4 LB: > { %2631 = sst [smem:[#allocation9_spill]] %s2271_s25  ;;  %s2370_s26 = sadd.s32 4294967295, %s2271_s25   ;;  %s2271_s25 = sphi %s2364_s25, %s26_s25  }
   0x5   : > { %p1887_p0 = scmp.ge.s32.totalorder %s2271_s25, 1  ;;  %p428_p1 = scmp.lt.s32.totalorder %s2271_s25, 3 }
   0x7   : > { %p429_p2 = pnand %p1887_p0, %p428_p1 }
   0x8   : > { %p488_p3 = scmp.lt.s32.totalorder (!%p429_p2), %s2370_s26, 1  ;;  %p1896_p4 = scmp.ne.s32.totalorder (!%p429_p2), %s2370_s26, 0 }
   0x9   : > { %432 = sbr.rel (%p429_p2) target bundleno = 2976 (0xba0), region = 68 }
  0x10   : > { %s2376_s27 = scalar_select %p488_p3, %s2370_s26, 1 }
  0x11   : > { %517 = sbr.rel (%p1896_p4) target bundleno = 24 (0x18), region = 72  ;;  %v518_v0 = vld [vmem:[%s2614_s0] sm:$0xff] (!%p1896_p4)  ;;  %vm519_vm0 = vcmask (!%p1896_p4), 261120  }
  0x12   : > { %s1928_s14 = sshll.u32 %s2376_s27, 5  ;;  %s503_s23 = scalar_lea.vmem %s2622_s8, %s2376_s27  ;;  %520 = vst.msk [vmem:[#allocation2] sm:$0xff] (!%p1896_p4), %vm519_vm0, %v518_v0  ;;  %522 = vst.msk [vmem:[#allocation5] sm:$0xff] (!%p1896_p4), %vm519_vm0, %v518_v0 }
  0x13   : > { %s495_s17 = scalar_lea.vmem %s2620_s6, %s1928_s14  ;;  %s2389_s20 = scalar_lea.vmem %s2621_s7, %s1928_s14 }
  0x14   : > { %s2398_s29 = scalar_lea.vmem %s2623_s9, %s1928_s14  ;;  %s1931_s30 = sshll.u32 %s2376_s27, 6 }
  0x15   : > { %s2404_s15 = scalar_lea.vmem %s2624_s10, %s1931_s30 }
  0x18 PF: > { %vm533_vm1 = vcmask 261120   ;;  %v549_v4 = vld [vmem:[%s495_s17] sm:$0xff]  ;;  %v550_v5 = vld [vmem:[%s495_s17 + $0x8] sm:$0xff]  ;;  %v551_v6 = vld [vmem:[%s495_s17 + $0x10] sm:$0xff]  ;;  %v2273_v7 = vmov 0.0|0.0   ;;  %vm2274_vm2 = vmmov 0   ;;  %s2632_s25 = scalar_lea.vmem %s2619_s5, %s2376_s27 }
  0x19   : > { %v2410_v1 = vld [vmem:[#allocation2] sm:$0xff]  ;;  %2096 = vmatprep.subr.bf16.mxu1 %v2273_v7  ;;  %v2097_v8 = vpack.c.bf16 %v550_v5, %v549_v4  ;;  %v552_v9 = vld [vmem:[%s495_s17 + $0x18] sm:$0xff]  ;;  %v2275_v10 = vmov 0.0   ;;  %2108 = vmatprep.subr.bf16.mxu0 %v2273_v7  ;;  %v528_v14 = vld [vmem:[%s2618_s4 + $0x8] sm:$0xff]  ;;  %s2276_s21 = smov 32   ;;  %s2277_s30 = smov 96  }
  0x1a   : > { %v532_v2 = vmul.f32 %v2410_v1, %v2410_v1  ;;  %1990 = vmatprep.mubr.msk.f32.mxu1 %vm2274_vm2, %v2275_v10  ;;  %2012 = vmatprep.mubr.msk.f32.mxu0 %vm2274_vm2, %v2275_v10  ;;  %v2100_v11 = vpack.c.bf16 %v552_v9, %v551_v6  ;;  %v524_v12 = vld [vmem:[%s2616_s2] sm:$0xff]  ;;  %v529_v16 = vld [vmem:[%s2618_s4 + $0x10] sm:$0xff]  ;;  %v530_v17 = vld [vmem:[%s2618_s4 + $0x18] sm:$0xff]  ;;  %s2278_s19 = smov 120   ;;  %s2279_s22 = smov 72   ;;  %vm790_vm3 = vcmask 64512  }
  0x1b   : > { %2098 = vmatpush3.bf16.msra.mxu1 %v2097_v8  ;;  %v527_v13 = vld [vmem:[%s2618_s4] sm:$0xff]  ;;  %703 = vrot.lane.b32.xlu1 %v524_v12, %s2276_s21  ;;  %v2106_v18 = vpack.c.bf16 %v530_v17, %v529_v16  ;;  %s2280_s24 = smov 88   ;;  %s2281_s28 = smov 80   ;;  %vm1461_vm4 = vcmask 130048   ;;  %vm1463_vm5 = vcmask 195584   ;;  %vm1656_vm6 = vcmask 523264  }
  0x1c   : > { %v534_v3 = vsel %vm533_vm1, %v532_v2, 0.0  ;;  %2099 = vmatprep.subr.bf16.mxu1 %v2273_v7  ;;  %v2103_v15 = vpack.c.bf16 %v528_v14, %v527_v13  ;;  %v1897_v23 = vld [vmem:[%s2632_s25] ss:$0 sm:$0xff]  ;;  %s2282_s16 = smov 112   ;;  %s2283_s18 = smov 104  }
  0x1d   : > { %535 = vadd.xlane.f32.xlu0 %v534_v3  ;;  %v525_v29 = vld [vmem:[%s2617_s3] sm:$0xff]  ;;  %s2284_s25 = smov 64   ;;  %s2286_s14 = smov 40  }
  0x1e   : > { %2110 = vmatpush3.bf16.msra.mxu0 %v2103_v15  ;;  %v526_v49 = vld [vmem:[%s2615_s1] sm:$0xff]  ;;  %s2287_s17 = smov 56   ;;  %s1918_s27 = sshll.u32 %s2370_s26, 3 }
  0x1f   : > { %2101 = vmatpush3.bf16.msra.mxu1 %v2100_v11  ;;  %2111 = vmatprep.subr.bf16.mxu0 %v2273_v7  ;;  %p1920_p5 = scmp.ne.s32.totalorder %s2370_s26, 1 }
  0x20   : > { %2102 = vmatprep.subr.bf16.mxu1 %v2273_v7 }
  0x22   : > { %2113 = vmatpush3.bf16.msra.mxu0 %v2106_v18 }
  0x23   : > { %2025 = vmatprep.subr.mxu0 %v2275_v10 }
  0x8d   : > { %v704_v38 = vpop.permute.xlu1 %703 }
  0xaa   : > { %v536_v19 = vpop.xlane.xlu0 %535 }
  0xab   : > { %v538_v20 = vmul.f32 0.03125, %v536_v19 }
  0xad   : > { %v539_v21 = vadd.f32 1e-06, %v538_v20 }
  0xaf   : > { %2179 = vrsqrt.f32 %v539_v21 }
  0xb9   : > { %v2180_v22 = vpop.eup %2179 }
  0xba   : > { %v541_v24 = vmul.f32 %v2180_v22, %v2410_v1 }
  0xbc   : > { %v548_v25 = vmul.f32 %v1897_v23, %v541_v24 }
  0xbe   : > { %1991 = vmatmul.mubr.msk.f32.vlgmr.msra.gmra.mrb[0].mxu1 %vm533_vm1, %v548_v25 }
  0xbf   : > { %2104 = vmatpush3.bf16.msra.mxu1 %v2103_v15  ;;  %2001 = vmatprep.mubr.msk.f32.mxu1 %vm2274_vm2, %v2275_v10 }
  0xc0   : > { %2105 = vmatprep.subr.bf16.mxu1 %v2273_v7 }
  0xc3   : > { %2107 = vmatpush3.bf16.msra.mxu1 %v2106_v18 }
  0xc4   : > { %2015 = vmatprep.subr.mxu1 %v2275_v10 }
 0x191   : > { %v2452_v26 = vpop.f32.mrb[0].mxu1 }
 0x192   : > { %707 = vrot.lane.b32.xlu0 %v2452_v26, %s2277_s30  ;;  %v1992_v27 = vpop.f32.mrb[1].mxu1  ;;  %2002 = vmatmul.mubr.msk.f32.vlgmr.msra.gmra.mrb[2].mxu1 %vm533_vm1, %v2452_v26  ;;  %v626_v31 = vmul.f32 %v2452_v26, %v524_v12  ;;  %v706_v39 = vmul.f32 %v704_v38, %v2452_v26 }
 0x193   : > { %2017 = vmatprep.mubr.msk.f32.mxu1 %vm2274_vm2, %v2275_v10 }
 0x204   : > { %v708_v28 = vpop.permute.xlu0 %707 }
 0x205   : > { %2013 = vmatmul.mubr.msk.f32.vlgmr.msra.gmra.mrb[0].mxu0 %vm533_vm1, %v708_v28 }
 0x206   : > { %2027 = vmatprep.mubr.msk.f32.mxu0 %vm2274_vm2, %v2275_v10 }
 0x265   : > { %v696_v30 = vpop.f32.mrb[2].mxu1 }
 0x266   : > { %v700_v32 = vmul.f32 %v696_v30, %v525_v29  ;;  %v2003_v33 = vpop.f32.mrb[3].mxu1 }
 0x268   : > { %v701_v34 = vadd.f32 %v700_v32, %v626_v31 }
 0x2d8   : > { %v777_v35 = vpop.f32.mrb[0].mxu0 }
 0x2d9   : > { %v781_v36 = vmul.f32 %v777_v35, %v525_v29  ;;  %v2014_v37 = vpop.f32.mrb[1].mxu0 }
 0x2db   : > { %783 = vrot.lane.b32.xlu1 %v781_v36, %s2276_s21 }
 0x2df   : > { %953 = vrot.lane.b32.xlu1 %v701_v34, %s2278_s19  ;;  %s2288_s19 = smov 8  }
 0x34d   : > { %v784_v40 = vpop.permute.xlu1 %783 }
 0x34e   : > { %v786_v41 = vadd.f32 %v784_v40, %v706_v39 }
 0x350   : > { %1285 = vrot.lane.b32.xlu0 %v786_v41, %s2279_s22  ;;  %788 = vrot.lane.b32.xlu1 %v786_v41, %s2277_s30  ;;  %s2285_s30 = smov 48   ;;  %s2289_s22 = smov 16  }
 0x351   : > { %v954_v42 = vpop.permute.xlu1 %953 }
 0x354   : > { %955 = vrot.lane.b32.xlu1 %v786_v41, %s2280_s24  ;;  %s2290_s24 = smov 24  }
 0x358   : > { %1120 = vrot.lane.b32.xlu1 %v786_v41, %s2281_s28  ;;  %v1465_v41 = vld [vmem:[%s2389_s20] sm:$0xff] }
 0x35c   : > { %1118 = vrot.lane.b32.xlu1 %v701_v34, %s2282_s16 }
 0x360   : > { %1283 = vrot.lane.b32.xlu1 %v701_v34, %s2283_s18 }
 0x3c2   : > { %v789_v43 = vpop.permute.xlu1 %788  ;;  %v1286_v47 = vpop.permute.xlu0 %1285 }
 0x3c3   : > { %2016 = vmatpush3.xpose.msk.msra.mxu1 %vm790_vm3, %v789_v43 }
 0x3c4   : > { %2020 = vmatprep.subr.mxu1 %v2275_v10 }
 0x3c6   : > { %2018 = vmatmul.mubr.msk.f32.vlgmr.msra.gmra.mrb[4].mxu1 %vm790_vm3, %v701_v34  ;;  %v956_v44 = vpop.permute.xlu1 %955 }
 0x3c7   : > { %2026 = vmatpush3.xpose.msk.msra.mxu0 %vm790_vm3, %v956_v44  ;;  %2022 = vmatprep.mubr.msk.f32.mxu1 %vm2274_vm2, %v2275_v10  ;;  %v1467_v44 = vld [vmem:[%s2389_s20 + $0x10] sm:$0xff] }
 0x3c8   : > { %2035 = vmatprep.subr.mxu0 %v2275_v10 }
 0x3ca   : > { %2028 = vmatmul.mubr.msk.f32.vlgmr.msra.gmra.mrb[2].mxu0 %vm790_vm3, %v954_v42  ;;  %v1121_v45 = vpop.permute.xlu1 %1120  ;;  %v1466_v42 = vld [vmem:[%s2389_s20 + $0x8] sm:$0xff] }
 0x3cb   : > { %2036 = vmatpush3.xpose.msk.msra.mxu0 %vm790_vm3, %v1121_v45  ;;  %2037 = vmatprep.mubr.msk.f32.mxu0 %vm2274_vm2, %v2275_v10  ;;  %v2115_v43 = vpack.c.bf16 %v1466_v42, %v1465_v41  ;;  %v1468_v45 = vld [vmem:[%s2389_s20 + $0x18] sm:$0xff] }
 0x3cc   : > { %2045 = vmatprep.subr.mxu0 %v2275_v10 }
 0x3ce   : > { %v1119_v46 = vpop.permute.xlu1 %1118 }
 0x3cf   : > { %2038 = vmatmul.mubr.msk.f32.vlgmr.msra.gmra.mrb[4].mxu0 %vm790_vm3, %v1119_v46  ;;  %v2118_v46 = vpack.c.bf16 %v1468_v45, %v1467_v44  ;;  %v1921_v45 = vld [vmem:[%s2625_s11] ss:$0 sm:$0xff] (!%p1920_p5) }
 0x3d0   : > { %2046 = vmatpush3.xpose.msk.msra.mxu0 %vm790_vm3, %v1286_v47  ;;  %2047 = vmatprep.mubr.msk.f32.mxu0 %vm2274_vm2, %v2275_v10 }
 0x3d1   : > { %2114 = vmatprep.subr.bf16.mxu0 %v2273_v7 }
 0x3d2   : > { %v1284_v48 = vpop.permute.xlu1 %1283 }
 0x3d3   : > { %2048 = vmatmul.mubr.msk.f32.vlgmr.msra.gmra.mrb[6].mxu0 %vm790_vm3, %v1284_v48 }
 0x3d4   : > { %2063 = vmatprep.mubr.msk.f32.mxu0 %vm2274_vm2, %v2275_v10  ;;  %2116 = vmatpush3.bf16.msra.mxu0 %v2115_v43 }
 0x3d5   : > { %2117 = vmatprep.subr.bf16.mxu0 %v2273_v7 }
 0x3d8   : > { %2119 = vmatpush3.bf16.msra.mxu0 %v2118_v46 }
 0x3d9   : > { %2126 = vmatprep.subr.bf16.mxu0 %v2273_v7 }
 0x499   : > { %v862_v50 = vpop.f32.mrb[4].mxu1 }
 0x49a   : > { %v863_v51 = vadd.f32 %v862_v50, %v526_v49  ;;  %v2019_v52 = vpop.f32.mrb[5].mxu1 }
 0x49c   : > { %v866_v53 = vsel %vm790_vm3, %v863_v51, -inf }
 0x49d   : > { %v1027_v54 = vpop.f32.mrb[2].mxu0  ;;  %867 = vmax.xlane.f32.xlu0 %v866_v53 }
 0x49e   : > { %v1028_v55 = vadd.f32 %v1027_v54, %v526_v49  ;;  %v2029_v56 = vpop.f32.mrb[3].mxu0 }
 0x4a0   : > { %v1031_v57 = vsel %vm790_vm3, %v1028_v55, -inf }
 0x4a1   : > { %1032 = vmax.xlane.f32.xlu1 %v1031_v57 }
 0x4a2   : > { %v1192_v58 = vpop.f32.mrb[4].mxu0 }
 0x4a3   : > { %v1193_v59 = vadd.f32 %v1192_v58, %v526_v49  ;;  %v2039_v60 = vpop.f32.mrb[5].mxu0 }
 0x4a5   : > { %v1196_v61 = vsel %vm790_vm3, %v1193_v59, -inf }
 0x4a6   : > { %v1357_v62 = vpop.f32.mrb[6].mxu0  ;;  %1197 = vmax.xlane.f32.xlu0 %v1196_v61 }
 0x4a7   : > { %v1358_v63 = vadd.f32 %v1357_v62, %v526_v49  ;;  %v2049_v0 = vpop.f32.mrb[7].mxu0 }
 0x4a9   : > { %v1361_v2 = vsel %vm790_vm3, %v1358_v63, -inf }
 0x4aa   : > { %1362 = vmax.xlane.f32.xlu0 %v1361_v2 }
 0x4b2   : > { %877 = vrot.lane.b32.xlu1 %v2452_v26, %s2284_s25 }
 0x52a   : > { %v868_v3 = vpop.xlane.xlu0 %867 }
 0x52b   : > { %v869_v4 = vsub.f32 %v863_v51, %v868_v3  ;;  %v1559_v3 = vld [vmem:[%s2398_s29] sm:$0xff] }
 0x52d   : > { %v870_v5 = vmul.f32 1.442695, %v869_v4  ;;  %v1560_v4 = vld [vmem:[%s2398_s29 + $0x8] sm:$0xff] }
 0x52e   : > { %v1033_v6 = vpop.xlane.xlu1 %1032 }
 0x52f   : > { %2181 = vpow2.f32 %v870_v5  ;;  %v1034_v8 = vsub.f32 %v1028_v55, %v1033_v6  ;;  %v2121_v5 = vpack.c.bf16 %v1560_v4, %v1559_v3  ;;  %v1561_v6 = vld [vmem:[%s2398_s29 + $0x10] sm:$0xff] }
 0x531   : > { %v1035_v9 = vmul.f32 1.442695, %v1034_v8 }
 0x532   : > { %v878_v11 = vpop.permute.xlu1 %877 }
 0x533   : > { %2183 = vpow2.f32 %v1035_v9  ;;  %2021 = vmatpush3.msra.mxu1 %v878_v11  ;;  %v1198_v12 = vpop.xlane.xlu0 %1197 }
 0x534   : > { %v1199_v13 = vsub.f32 %v1193_v59, %v1198_v12  ;;  %2030 = vmatprep.subr.mxu1 %v2275_v10 }
 0x536   : > { %v1200_v14 = vmul.f32 1.442695, %v1199_v13  ;;  %v1914_v13 = vld [vmem:[%s503_s23] ss:$0 sm:$0xff]  ;;  %s1829_s23 = scalar_lea.vmem [#allocation5], %s1918_s27 }
 0x537   : > { %v1363_v15 = vpop.xlane.xlu0 %1362 }
 0x538   : > { %2185 = vpow2.f32 %v1200_v14  ;;  %v1364_v16 = vsub.f32 %v1358_v63, %v1363_v15 }
 0x539   : > { %v2182_v17 = vpop.eup %2181 }
 0x53a   : > { %v1365_v18 = vmul.f32 1.442695, %v1364_v16  ;;  %v872_v19 = vsel %vm790_vm3, %v2182_v17, 0.0  ;;  %v1648_v16 = vld [vmem:[%s2404_s15] sm:$0xff] }
 0x53b   : > { %873 = vadd.xlane.f32.xlu1 %v872_v19 }
 0x53c   : > { %2187 = vpow2.f32 %v1365_v18  ;;  %v1650_v18 = vld [vmem:[%s2404_s15 + $0x10] sm:$0xff] }
 0x53d   : > { %v2184_v20 = vpop.eup %2183 }
 0x53e   : > { %v1037_v21 = vsel %vm790_vm3, %v2184_v20, 0.0 }
 0x53f   : > { %1038 = vadd.xlane.f32.xlu0 %v1037_v21 }
 0x542   : > { %v2186_v22 = vpop.eup %2185 }
 0x543   : > { %v1202_v23 = vsel %vm790_vm3, %v2186_v22, 0.0 }
 0x544   : > { %1203 = vadd.xlane.f32.xlu1 %v1202_v23  ;;  %v1653_v23 = vld [vmem:[%s2404_s15 + $0x28] sm:$0xff] }
 0x546   : > { %v2188_v24 = vpop.eup %2187 }
 0x547   : > { %v1367_v25 = vsel %vm790_vm3, %v2188_v24, 0.0 }
 0x548   : > { %1368 = vadd.xlane.f32.xlu0 %v1367_v25  ;;  %v1654_v25 = vld [vmem:[%s2404_s15 + $0x30] sm:$0xff] }
 0x555   : > { %1207 = vrot.lane.b32.xlu1 %v2452_v26, %s2285_s30 }
 0x559   : > { %1372 = vrot.lane.b32.xlu1 %v2452_v26, %s2286_s14 }
 0x55e   : > { %1042 = vrot.lane.b32.xlu0 %v2452_v26, %s2287_s17 }
 0x5c8   : > { %v874_v27 = vpop.xlane.xlu1 %873 }
 0x5c9   : > { %2189 = vrcp.f32 %v874_v27  ;;  %v1655_v27 = vld [vmem:[%s2404_s15 + $0x38] sm:$0xff] }
 0x5cc   : > { %v1039_v28 = vpop.xlane.xlu0 %1038 }
 0x5cd   : > { %2191 = vrcp.f32 %v1039_v28  ;;  %v2136_v28 = vpack.c.bf16 %v1655_v27, %v1654_v25 }
 0x5d1   : > { %v1204_v29 = vpop.xlane.xlu1 %1203 }
 0x5d2   : > { %2193 = vrcp.f32 %v1204_v29 }
 0x5d3   : > { %v2190_v30 = vpop.eup %2189 }
 0x5d4   : > { %v876_v31 = vmul.f32 %v2190_v30, %v2182_v17  ;;  %v1649_v17 = vld [vmem:[%s2404_s15 + $0x8] sm:$0xff] }
 0x5d5   : > { %v1369_v32 = vpop.xlane.xlu0 %1368  ;;  %v1208_v35 = vpop.permute.xlu1 %1207  ;;  %v2127_v19 = vpack.c.bf16 %v1649_v17, %v1648_v16 }
 0x5d6   : > { %2195 = vrcp.f32 %v1369_v32  ;;  %2023 = vmatmul.mubr.msk.f32.vlgmr.msra.gmra.mrb[6].mxu1 %vm790_vm3, %v876_v31 }
 0x5d7   : > { %v2192_v33 = vpop.eup %2191  ;;  %2032 = vmatprep.mubr.msk.f32.mxu1 %vm2274_vm2, %v2275_v10 }
 0x5d8   : > { %v1041_v34 = vmul.f32 %v2192_v33, %v2184_v20  ;;  %v1651_v20 = vld [vmem:[%s2404_s15 + $0x18] sm:$0xff] }
 0x5d9   : > { %v1043_v36 = vpop.permute.xlu0 %1042  ;;  %v1373_v38 = vpop.permute.xlu1 %1372  ;;  %v2130_v21 = vpack.c.bf16 %v1651_v20, %v1650_v18 }
 0x5da   : > { %2031 = vmatpush3.msra.mxu1 %v1043_v36 }
 0x5db   : > { %2033 = vmatmul.mubr.msk.f32.vlgmr.msra.gmra.mrb[8].mxu1 %vm790_vm3, %v1041_v34  ;;  %2040 = vmatprep.subr.mxu1 %v2275_v10 }
 0x5dc   : > { %v2194_v26 = vpop.eup %2193  ;;  %2041 = vmatpush3.msra.mxu1 %v1208_v35  ;;  %2042 = vmatprep.mubr.msk.f32.mxu1 %vm2274_vm2, %v2275_v10 }
 0x5dd   : > { %v1206_v37 = vmul.f32 %v2194_v26, %v2186_v22  ;;  %2050 = vmatprep.subr.mxu1 %v2275_v10  ;;  %v1652_v22 = vld [vmem:[%s2404_s15 + $0x20] sm:$0xff] }
 0x5df   : > { %2043 = vmatmul.mubr.msk.f32.vlgmr.msra.gmra.mrb[10].mxu1 %vm790_vm3, %v1206_v37 }
 0x5e0   : > { %v2196_v39 = vpop.eup %2195  ;;  %2051 = vmatpush3.msra.mxu1 %v1373_v38  ;;  %2052 = vmatprep.mubr.msk.f32.mxu1 %vm2274_vm2, %v2275_v10 }
 0x5e1   : > { %v1371_v40 = vmul.f32 %v2196_v39, %v2188_v24  ;;  %2120 = vmatprep.subr.bf16.mxu1 %v2273_v7  ;;  %v2133_v24 = vpack.c.bf16 %v1653_v23, %v1652_v22 }
 0x5e3   : > { %2053 = vmatmul.mubr.msk.f32.vlgmr.msra.gmra.mrb[12].mxu1 %vm790_vm3, %v1371_v40 }
 0x5e4   : > { %2074 = vmatprep.mubr.msk.f32.mxu1 %vm2274_vm2, %v2275_v10  ;;  %2122 = vmatpush3.bf16.msra.mxu1 %v2121_v5 }
 0x5e5   : > { %2123 = vmatprep.subr.bf16.mxu1 %v2273_v7 }
 0x6a9   : > { %v949_v47 = vpop.f32.mrb[6].mxu1 }
 0x6aa   : > { %v2024_v48 = vpop.f32.mrb[7].mxu1 }
 0x6ae   : > { %v1114_v49 = vpop.f32.mrb[8].mxu1 }
 0x6af   : > { %1449 = vrot.lane.b32.xlu0 %v1114_v49, %s2288_s19  ;;  %v2034_v50 = vpop.f32.mrb[9].mxu1 }
 0x6b2   : > { %v1279_v51 = vpop.f32.mrb[10].mxu1 }
 0x6b3   : > { %1453 = vrot.lane.b32.xlu1 %v1279_v51, %s2289_s22  ;;  %v2044_v52 = vpop.f32.mrb[11].mxu1 }
 0x6b6   : > { %v1444_v53 = vpop.f32.mrb[12].mxu1 }
 0x6b7   : > { %1457 = vrot.lane.b32.xlu0 %v1444_v53, %s2290_s24  ;;  %v2054_v54 = vpop.f32.mrb[13].mxu1 }
 0x721   : > { %v1450_v55 = vpop.permute.xlu0 %1449 }
 0x722   : > { %v1460_v57 = vsel %vm790_vm3, %v949_v47, %v1450_v55 }
 0x725   : > { %v1454_v56 = vpop.permute.xlu1 %1453 }
 0x726   : > { %v1462_v58 = vsel %vm1461_vm4, %v1460_v57, %v1454_v56 }
 0x729   : > { %v1458_v59 = vpop.permute.xlu0 %1457 }
 0x72a   : > { %v1464_v60 = vsel %vm1463_vm5, %v1462_v58, %v1458_v59 }
 0x72b   : > { %2064 = vmatmul.mubr.msk.f32.vlgmr.msra.gmra.mrb[8].mxu0 %vm533_vm1, %v1464_v60 }
 0x72c   : > { %2093 = vmatprep.mubr.msk.f32.mxu0 %vm2274_vm2, %v2275_v10  ;;  %v1562_v10 = vld [vmem:[%s2398_s29 + $0x18] sm:$0xff]  ;;  %2128 = vmatpush3.bf16.msra.mxu0 %v2127_v19 }
 0x72d   : > { %v2124_v8 = vpack.c.bf16 %v1562_v10, %v1561_v6  ;;  %2129 = vmatprep.subr.bf16.mxu0 %v2273_v7 }
 0x72f   : > { %2125 = vmatpush3.bf16.msra.mxu1 %v2124_v8 }
 0x730   : > { %2131 = vmatpush3.bf16.msra.mxu0 %v2130_v21 }
 0x731   : > { %2132 = vmatprep.subr.bf16.mxu0 %v2273_v7 }
 0x734   : > { %2134 = vmatpush3.bf16.msra.mxu0 %v2133_v24 }
 0x735   : > { %2135 = vmatprep.subr.bf16.mxu0 %v2273_v7 }
 0x738   : > { %2137 = vmatpush3.bf16.msra.mxu0 %v2136_v28 }
 0x7fe   : > { %v1538_v61 = vpop.f32.mrb[8].mxu0 }
 0x7ff   : > { %v1542_v62 = vadd.f32 %v1538_v61, %v2410_v1  ;;  %v2065_v63 = vpop.f32.mrb[9].mxu0 }
 0x801   : > { %v1544_v0 = vmul.f32 %v1542_v62, %v1542_v62 }
 0x803   : > { %v1545_v2 = vsel %vm533_vm1, %v1544_v0, 0.0 }
 0x804   : > { %1546 = vadd.xlane.f32.xlu1 %v1545_v2 }
 0x891   : > { %v1547_v1 = vpop.xlane.xlu1 %1546 }
 0x892   : > { %v1548_v9 = vmul.f32 0.03125, %v1547_v1 }
 0x894   : > { %v1549_v11 = vadd.f32 1e-06, %v1548_v9 }
 0x896   : > { %2197 = vrsqrt.f32 %v1549_v11 }
 0x8a0   : > { %v2198_v12 = vpop.eup %2197 }
 0x8a1   : > { %v1551_v14 = vmul.f32 %v2198_v12, %v1542_v62 }
 0x8a3   : > { %v1558_v15 = vmul.f32 %v1914_v13, %v1551_v14 }
 0x8a5   : > { %2075 = vmatmul.mubr.msk.f32.vlgmr.msra.gmra.mrb[14].mxu1 %vm533_vm1, %v1558_v15 }
 0x978   : > { %v1632_v29 = vpop.f32.mrb[14].mxu1 }
 0x979   : > { %1644 = vrot.lane.b32.xlu0 %v1632_v29, %s2284_s25  ;;  %v2076_v30 = vpop.f32.mrb[15].mxu1  ;;  %v1916_v31 = vmul.f32 -1.442695, %v1632_v29 }
 0x97b   : > { %2199 = vpow2.f32 %v1916_v31 }
 0x985   : > { %v2200_v32 = vpop.eup %2199 }
 0x986   : > { %v1639_v33 = vadd.f32 1.0, %v2200_v32 }
 0x988   : > { %2201 = vrcp.f32 %v1639_v33 }
 0x992   : > { %v2202_v34 = vpop.eup %2201 }
 0x993   : > { %v1642_v35 = vmul.f32 %v2202_v34, %v1632_v29 }
 0x9eb   : > { %v1645_v36 = vpop.permute.xlu0 %1644 }
 0x9ec   : > { %v1647_v26 = vmul.f32 %v1645_v36, %v1642_v35 }
 0x9ee   : > { %2094 = vmatmul.mubr.msk.f32.vlgmr.msra.gmra.mrb[10].mxu0 %vm1656_vm6, %v1647_v26 }
 0xabe   : > { %1739 = sbr.rel (%p1920_p5) target bundleno = 2921 (0xb69), region = 76 }
 0xac1   : > { %v1726_v37 = vpop.f32.mrb[10].mxu0 }
 0xac2   : > { %v1730_v7 = vadd.f32 %v1726_v37, %v1542_v62  ;;  %v2095_v38 = vpop.f32.mrb[11].mxu0 }
 0xac4   : > { %1731 = vst.msk [vmem:[#allocation2] sm:$0xff] %vm533_vm1, %v1730_v7  ;;  %1919 = vst.msk [vmem:[%s1829_s23 + $0x8] sm:$0xff] %vm533_vm1, %v1730_v7  ;;  %v1741_v39 = vmul.f32 (!%p1920_p5), %v1730_v7, %v1730_v7 }
 0xac6   : > { %v1742_v40 = vsel %vm533_vm1, %v1741_v39, 0.0 }
 0xac7   : > { %1743 = vadd.xlane.f32.xlu0 %v1742_v40 }
 0xb54   : > { %v1744_v41 = vpop.xlane.xlu0 %1743 }
 0xb55   : > { %v1745_v42 = vmul.f32 0.03125, %v1744_v41 }
 0xb57   : > { %v1746_v43 = vadd.f32 1e-06, %v1745_v42 }
 0xb59   : > { %2203 = vrsqrt.f32 %v1746_v43 }
 0xb63   : > { %v2204_v44 = vpop.eup %2203 }
 0xb64   : > { %v1748_v46 = vmul.f32 %v2204_v44, %v1730_v7 }
 0xb66   : > { %v1755_v47 = vmul.f32 %v1921_v45, %v1748_v46 }
 0xb68   : > { %1756 = vst.msk [vmem:[#allocation3] sm:$0xff] %vm533_vm1, %v1755_v47 }
 0xb69 PF: > { %p2146_p6 = scmp.eq.s32.totalorder %s2370_s26, 1  ;;  %s2291_s16 = smov [#allocation3]  }
 0xb6a   : > { %s1764_s18 = sshll.u32 %s2291_s16, 4  ;;  %s2292_s21 = smov [#allocation5]   ;;  %s1765_s18 = int_to_ptr.vmem [resolvable:$true] %s1764_s18 }
 0xb6b   : > { %s1774_s13 = sshll.u32 %s2292_s21, 4  ;;  %s2205_s25 = scalar_lea.vmem %s1765_s18, 128  ;;  %s1775_s13 = int_to_ptr.vmem [resolvable:$true] %s1774_s13 }
 0xb6c   : > { %p2206_p7 = scmp.ne.s32.totalorder %s1765_s18, %s2205_s25  ;;  %p2212_p10 = scmp.lt.s32.totalorder %s1765_s18, %s1765_s18 }
 0xb6d   : > { %p2213_p11 = scmp.lt.s32.totalorder %s2205_s25, %s2205_s25 }
 0xb6e   : > { %p2207_p8 = pnand %p2206_p7, %p2146_p6 }
 0xb6f   : > { %p2214_p12 = por %p2213_p11, %p2212_p10 }
 0xb70   : > { %p2208_p9 = pneg %p2207_p8 }
 0xb72   : > { %p2215_p13 = pnand %p2214_p12, %p2208_p9 }
 0xb74   : > { %2218 = shalt.err (!%p2215_p13)
}
 0xb75   : > { %s2219_s17 = scalar_lea.hbm %s2626_s12, 128 }
 0xb76   : > { %p2220_p0 = scmp.ne.s32.totalorder %s2626_s12, %s2219_s17  ;;  %p2225_p3 = scmp.lt.u32.totalorder %s2219_s17, %s2626_s12 }
 0xb78   : > { %p2221_p1 = pnand %p2220_p0, %p2146_p6 }
 0xb7a   : > { %p2222_p2 = pneg %p2221_p1 }
 0xb7c   : > { %p2227_p4 = pnand %p2225_p3, %p2222_p2 }
 0xb7e   : > { %2230 = shalt.err (!%p2227_p4)
}
 0xb7f   : > { %2139 = dma.vmem_to_hbm [thread:$0]  (%p2146_p6), %s1765_s18, 128, %s2626_s12, [#allocation4]  }
 0xb80   : > { %s2231_s29 = scalar_lea.vmem %s1775_s13, 384  ;;  %p2238_p9 = scmp.lt.s32.totalorder %s1775_s13, %s1775_s13 }
 0xb81   : > { %p2232_p5 = scmp.ne.s32.totalorder %s1775_s13, %s2231_s29  ;;  %p2239_p10 = scmp.lt.s32.totalorder %s2231_s29, %s2231_s29 }
 0xb83   : > { %p2233_p7 = pnand %p2232_p5, %p2146_p6  ;;  %p2240_p11 = por %p2239_p10, %p2238_p9 }
 0xb85   : > { %p2234_p8 = pneg %p2233_p7 }
 0xb87   : > { %p2241_p12 = pnand %p2240_p11, %p2234_p8 }
 0xb89   : > { %2244 = shalt.err (!%p2241_p12)
}
 0xb8a   : > { %s2633_s21 = sld [smem:[#allocation10_spill]] }
 0xb90   : > { %s2245_s25 = scalar_lea.hbm %s2633_s21, 384 }
 0xb91   : > { %p2246_p13 = scmp.ne.s32.totalorder %s2633_s21, %s2245_s25  ;;  %p2251_p2 = scmp.lt.u32.totalorder %s2245_s25, %s2633_s21 }
 0xb93   : > { %p2247_p0 = pnand %p2246_p13, %p2146_p6 }
 0xb95   : > { %p2248_p1 = pneg %p2247_p0 }
 0xb97   : > { %p2253_p3 = pnand %p2251_p2, %p2248_p1 }
 0xb99   : > { %2256 = shalt.err (!%p2253_p3)
}
 0xb9a   : > { %s2293_s22 = smov 128  }
 0xb9b   : > { %2141 = dma.vmem_to_hbm [thread:$0]  (%p2146_p6), %s1775_s13, 384, %s2633_s21, [#allocation6], %s2293_s22, %s2293_s22, %s2288_s19  }
 0xb9c   : > { %2262 = dma.done.wait (%p2146_p6), [#allocation4], 128  }
 0xb9d   : > { %2264 = vsyncadd (%p2146_p6), [#allocation4], 4294967168 }
 0xb9e   : > { %2266 = dma.done.wait (%p2146_p6), [#allocation6], 384  }
 0xb9f   : > { %2268 = vsyncadd (%p2146_p6), [#allocation6], 4294966912 }
 0xba0 PF: > { %s2634_s28 = sld [smem:[#allocation9_spill]] }
 0xba6   : > { %s26_s25 = sadd.s32 1, %s2634_s28  }
 0xba7   : > { %p23_p4 = scmp.ge.s32.totalorder %s26_s25, 4  }
 0xba9   :  { %25 = sbr.rel (!%p23_p4) target bundleno = 4 (0x4), region = 127 }
 0xbb0   :  { %1794 = vsyncpa [#allocation4], 1 }
 0xbb1   :  { %1796 = vsyncpa [#allocation4 + $0x1], 1 }
 0xbb2   :  { %1797 = vsyncpa [#allocation6], 1 }

</bundles_post_ra>
